<compile_context>
chip_gen: v7x
topology: tpu7x:2x2x1
jax: 0.10.0
libtpu: 0.0.40
codegen_flags: <defaults>
</compile_context>

<pallas_src>
import numpy as np
import jax
import jax.numpy as jnp
from jax import lax
from jax.experimental import pallas as pl
from jax.experimental.pallas import tpu as pltpu


def _patch_merging_kernel(x_ref, w_ref, b_ref, o_ref):
    # x_ref: (th, 2, W, 2C)  -- one contiguous tile of rearranged rows
    # w_ref: (2, 2C, 2C)     -- w_ref[s1] is the (K=2C, N=2C) weight slab
    # b_ref: (1, 2C)
    # o_ref: (th, W, 2C)
    th, _, W, K2 = x_ref.shape
    N = o_ref.shape[-1]
    M = th * W

    x = x_ref[...]                              # single tile load
    x0 = x[:, 0, :, :].reshape(M, K2)           # s1 = 0 plane
    x1 = x[:, 1, :, :].reshape(M, K2)           # s1 = 1 plane

    w0 = w_ref[0]                               # (K2, N)
    w1 = w_ref[1]                               # (K2, N)

    # Canonical (M,K)@(K,N) contractions, f32 accumulation on the MXU.
    dn = (((1,), (0,)), ((), ()))
    acc = lax.dot_general(x0, w0, dn, preferred_element_type=jnp.float32)
    acc = acc + lax.dot_general(x1, w1, dn, preferred_element_type=jnp.float32)
    acc = acc + b_ref[...].astype(jnp.float32)

    o_ref[...] = acc.reshape(th, W, N).astype(o_ref.dtype)


def _vmem_capacity_bytes():
    try:
        return int(pltpu.get_tpu_info().vmem_capacity_bytes)
    except Exception:
        return 64 * 1024 * 1024          # conservative fallback (v7x-sized)


def _pick_row_tile(BH, W, C, itemsize, vmem_cap):
    """Largest h-row tile `th` dividing B*H that fits a chip-aware VMEM budget."""
    N = 2 * C
    K2 = 2 * C

    # Resident weight stack + bias: constant index map, still 2x-buffered by default.
    fixed = 2 * (2 * K2 * N + N) * itemsize
    # Per h-row bytes: input tile (2*W*K2) x2 buffers, output (W*N) x2 buffers,
    # plus ~2x (W*N) f32 accumulator temporaries (not double-buffered).
    per_h = (2 * (2 * W * K2) * itemsize
             + 2 * (W * N) * itemsize
             + 2 * (W * N) * 4)

    small_vmem = vmem_cap < 96 * 1024 * 1024          # v7x-like (2 TCs, 64 MiB)
    budget = max(vmem_cap * 3 // 8, 4 * 1024 * 1024)  # ~24 MiB v7x, ~48 MiB v5e/v6e
    cap = max(1, (budget - fixed) // per_h)

    # Per-step output-row target: bigger tiles on big-VMEM single-TC chips.
    rows_target = 4096 if small_vmem else 8192
    cap = min(cap, max(1, rows_target // max(W, 1)))

    # On 2-TC chips keep >=4 grid blocks so each core pipelines >=2 steps.
    if small_vmem and BH >= 4:
        cap = min(cap, BH // 4)
    cap = max(1, min(cap, BH))

    # Largest divisor of BH <= cap (divisor 1 always exists -> bounded fallback).
    best_any, best_even = 1, None
    for cand in range(1, cap + 1):
        if BH % cand == 0:
            best_any = cand
            if (BH // cand) % 2 == 0:
                best_even = cand
    if small_vmem and best_even is not None:
        return best_even                  # even grid -> balanced megacore split
    return best_any


@jax.jit
def patch_merging(x, weight, bias):
    """PatchMerging forward.

    x:      (B, L, C)
    weight: (2C, 4C)   -- PyTorch nn.Linear weight layout (out, in)
    bias:   (2C,)
    returns (B, L//4, 2C)
    """
    B, L, C = x.shape
    H = W = int(np.sqrt(L) / 2)
    assert 4 * H * W == L, "L must be a perfect square divisible into 2x2 patches"
    # TODO(synk): non-square (H != W) feature maps would need H, W passed explicitly.

    N = 2 * C                     # output features
    K2 = 2 * C                    # per-s1 contraction width
    BH = B * H
    itemsize = np.dtype(x.dtype).itemsize

    # Metadata-only view: (B, (h s1 w s2), C) -> (B*H, s1, W, (s2 c)).
    xr = x.reshape(BH, 2, W, 2 * C)

    # One-time weight transpose + split: w_stack[s1] = weight[:, s1*2C:(s1+1)*2C].T
    w_stack = weight.astype(x.dtype).T.reshape(2, K2, N)
    bias2d = bias.astype(x.dtype).reshape(1, N)

    vmem_cap = _vmem_capacity_bytes()
    th = _pick_row_tile(BH, W, C, itemsize, vmem_cap)
    grid = (BH // th,)

    cost = pl.CostEstimate(
        flops=2 * (BH * W) * (4 * C) * N,
        transcendentals=0,
        bytes_accessed=(B * L * C + BH * W * N + 4 * C * N + N) * itemsize,
    )

    out3d = pl.pallas_call(
        _patch_merging_kernel,
        out_shape=jax.ShapeDtypeStruct((BH, W, N), x.dtype),
        grid=grid,
        in_specs=[
            # One contiguous block per step: both s1 planes of the row tile.
            pl.BlockSpec((th, 2, W, 2 * C), lambda i: (i, 0, 0, 0)),
            # Full weight stack, constant index map -> fetched once, resident.
            pl.BlockSpec((2, K2, N), lambda i: (0, 0, 0)),
            pl.BlockSpec((1, N), lambda i: (0, 0)),
        ],
        out_specs=pl.BlockSpec((th, W, N), lambda i: (i, 0, 0)),
        compiler_params=pltpu.CompilerParams(
            dimension_semantics=("parallel",),
            vmem_limit_bytes=int(vmem_cap * 3 // 4),
        ),
        cost_estimate=cost,
    )(xr, w_stack, bias2d)

    return out3d.reshape(B, H * W, N)


if __name__ == "__main__":
    # Small deterministic example: C = 64, H = W = 16 -> L = 1024, B = 2.
    # (2C = 128 keeps the output lane-dense; W = 16 keeps the in-kernel
    #  flatten a free relabel for both f32 and bf16.)
    B, C = 2, 64
    H = W = 16
    L = 4 * H * W

    key = jax.random.PRNGKey(0)
    kx, kw, kb = jax.random.split(key, 3)

    x = jax.random.normal(kx, (B, L, C), dtype=jnp.float32)
    bound = 1.0 / np.sqrt(4 * C)
    weight = jax.random.uniform(kw, (2 * C, 4 * C), jnp.float32, -bound, bound)
    bias = jax.random.uniform(kb, (2 * C,), jnp.float32, -bound, bound)

    out = jax.block_until_ready(patch_merging(x, weight, bias))
    assert out.shape == (B, L // 4, 2 * C)

    # Pure-JAX reference (tolerance covers MXU default-precision passes and the
    # split-K accumulation order inside the kernel).
    xr = x.reshape(B, H, 2, W, 2, C).transpose(0, 1, 3, 2, 4, 5).reshape(B, H * W, 4 * C)
    ref = xr @ weight.T + bias
    np.testing.assert_allclose(np.asarray(out), np.asarray(ref), rtol=1e-3, atol=1e-3)

    # bf16 path: halves HBM traffic on this bandwidth-bound op; accumulation is
    # still f32 inside the kernel.
    out_bf16 = jax.block_until_ready(
        patch_merging(x.astype(jnp.bfloat16),
                      weight.astype(jnp.bfloat16),
                      bias.astype(jnp.bfloat16)))
    np.testing.assert_allclose(np.asarray(out_bf16, dtype=np.float32),
                               np.asarray(ref), rtol=5e-2, atol=5e-2)

    print("KERNEL_OK")
</pallas_src>

<mosaic_0001>
module attributes {stable_mosaic.version = 11 : i64} {
  func.func @_patch_merging_kernel(%arg0: i32, %arg1: memref<8x2x16x128xf32, #tpu.memory_space<vmem>>, %arg2: memref<2x128x128xf32, #tpu.memory_space<vmem>>, %arg3: memref<1x128xf32, #tpu.memory_space<vmem>>, %arg4: memref<8x16x128xf32, #tpu.memory_space<vmem>>) attributes {dimension_semantics = [#tpu.dimension_semantics<parallel>], iteration_bounds = array<i64: 4>, scalar_prefetch = 0 : i64, scratch_operands = 0 : i64, tpu.core_type = #tpu.core_type<tc>, window_params = [{transform_indices = @transform_0, window_bounds = array<i64: 8, 2, 16, 128>}, {pipeline_mode = #tpu.pipeline_mode<synchronous>, transform_indices = @transform_1, window_bounds = array<i64: 2, 128, 128>}, {pipeline_mode = #tpu.pipeline_mode<synchronous>, transform_indices = @transform_2, window_bounds = array<i64: 1, 128>}, {transform_indices = @transform_3, window_bounds = array<i64: 8, 16, 128>}]} {
    %c0 = arith.constant 0 : index
    %c0_0 = arith.constant 0 : index
    %c0_1 = arith.constant 0 : index
    %c0_2 = arith.constant 0 : index
    %0 = vector.load %arg1[%c0, %c0_0, %c0_1, %c0_2] : memref<8x2x16x128xf32, #tpu.memory_space<vmem>>, vector<8x2x16x128xf32>
    %1 = vector.extract_strided_slice %0 {offsets = [0, 0, 0, 0], sizes = [8, 1, 16, 128], strides = [1, 1, 1, 1]} : vector<8x2x16x128xf32> to vector<8x1x16x128xf32>
    %2 = vector.shape_cast %1 : vector<8x1x16x128xf32> to vector<8x16x128xf32>
    %3 = vector.shape_cast %2 : vector<8x16x128xf32> to vector<128x128xf32>
    %4 = vector.extract_strided_slice %0 {offsets = [0, 1, 0, 0], sizes = [8, 1, 16, 128], strides = [1, 1, 1, 1]} : vector<8x2x16x128xf32> to vector<8x1x16x128xf32>
    %5 = vector.shape_cast %4 : vector<8x1x16x128xf32> to vector<8x16x128xf32>
    %6 = vector.shape_cast %5 : vector<8x16x128xf32> to vector<128x128xf32>
    %c0_3 = arith.constant 0 : index
    %c0_4 = arith.constant 0 : index
    %c0_5 = arith.constant 0 : index
    %7 = vector.load %arg2[%c0_3, %c0_4, %c0_5] : memref<2x128x128xf32, #tpu.memory_space<vmem>>, vector<1x128x128xf32>
    %8 = vector.shape_cast %7 : vector<1x128x128xf32> to vector<128x128xf32>
    %c1 = arith.constant 1 : index
    %c0_6 = arith.constant 0 : index
    %c0_7 = arith.constant 0 : index
    %9 = vector.load %arg2[%c1, %c0_6, %c0_7] : memref<2x128x128xf32, #tpu.memory_space<vmem>>, vector<1x128x128xf32>
    %10 = vector.shape_cast %9 : vector<1x128x128xf32> to vector<128x128xf32>
    %cst = arith.constant dense<0.000000e+00> : vector<128x128xf32>
    %11 = tpu.matmul %3, %8, %cst {dimension_numbers = #tpu.dot_dimension_numbers<[1], [0], [0], [1], [0, 0, 1, 1], [], []>} : vector<128x128xf32>, vector<128x128xf32>, vector<128x128xf32> -> vector<128x128xf32>
    %cst_8 = arith.constant dense<0.000000e+00> : vector<128x128xf32>
    %12 = tpu.matmul %6, %10, %cst_8 {dimension_numbers = #tpu.dot_dimension_numbers<[1], [0], [0], [1], [0, 0, 1, 1], [], []>} : vector<128x128xf32>, vector<128x128xf32>, vector<128x128xf32> -> vector<128x128xf32>
    %13 = arith.addf %11, %12 : vector<128x128xf32>
    %c0_9 = arith.constant 0 : index
    %c0_10 = arith.constant 0 : index
    %14 = vector.load %arg3[%c0_9, %c0_10] : memref<1x128xf32, #tpu.memory_space<vmem>>, vector<1x128xf32>
    %15 = vector.broadcast %14 : vector<1x128xf32> to vector<128x128xf32>
    %16 = arith.addf %13, %15 : vector<128x128xf32>
    %17 = vector.shape_cast %16 : vector<128x128xf32> to vector<8x16x128xf32>
    %c0_11 = arith.constant 0 : index
    %c0_12 = arith.constant 0 : index
    %c0_13 = arith.constant 0 : index
    %18 = vector.load %arg4[%c0_11, %c0_12, %c0_13] : memref<8x16x128xf32, #tpu.memory_space<vmem>>, vector<8x16x128xf32>
    tpu.vector_store %arg4[%c0_11, %c0_12, %c0_13], %17 {strides = array<i32>} : memref<8x16x128xf32, #tpu.memory_space<vmem>>, vector<8x16x128xf32>,
    return
  }
  func.func @transform_0(%arg0: i32) -> (i32, i32, i32, i32) {
    %c0_i32 = arith.constant 0 : i32
    %c0_i32_0 = arith.constant 0 : i32
    %c0_i32_1 = arith.constant 0 : i32
    %c0_i32_2 = arith.constant 0 : i32
    return %arg0, %c0_i32, %c0_i32_0, %c0_i32_1 : i32, i32, i32, i32
  }
  func.func @transform_1(%arg0: i32) -> (i32, i32, i32) {
    %c0_i32 = arith.constant 0 : i32
    %c0_i32_0 = arith.constant 0 : i32
    %c0_i32_1 = arith.constant 0 : i32
    %c0_i32_2 = arith.constant 0 : i32
    return %c0_i32, %c0_i32_0, %c0_i32_1 : i32, i32, i32
  }
  func.func @transform_2(%arg0: i32) -> (i32, i32) {
    %c0_i32 = arith.constant 0 : i32
    %c0_i32_0 = arith.constant 0 : i32
    %c0_i32_1 = arith.constant 0 : i32
    return %c0_i32, %c0_i32_0 : i32, i32
  }
  func.func @transform_3(%arg0: i32) -> (i32, i32, i32) {
    %c0_i32 = arith.constant 0 : i32
    %c0_i32_0 = arith.constant 0 : i32
    %c0_i32_1 = arith.constant 0 : i32
    return %arg0, %c0_i32, %c0_i32_0 : i32, i32, i32
  }
}

</mosaic_0001>

<bundles_post_ra>
// kernel: patch_merging.1
= control target key start
LH: loop header
LB: loop body
LE: loop exit
PB: predicated region body
PF: predicated region fallthrough
CT: control target
= control target key end

     0   :  { %8 = vsyncpa [#allocation3], 0  ;;  %s1340_s0 = inlined_call_operand.vmem [shape: f32[32,2,16,128], index: 0, kind: input, shape index: {}]   ;;  %s1341_s1 = inlined_call_operand.vmem [shape: f32[2,128,128], index: 1, kind: input, shape index: {}]   ;;  %s1342_s2 = inlined_call_operand.vmem [shape: f32[1,128], index: 2, kind: input, shape index: {}]   ;;  %s1343_s3 = inlined_call_operand.hbm [shape: f32[32,16,128], index: 3, kind: output, shape index: {}]  }
   0x1   :  { %10 = vsyncpa [#allocation3 + $0x1], 0  ;;  %s1064_s12 = smov 0   ;;  %s1066_s13 = smov 0  }
   0x2   :  { %s1068_s14 = smov 0   ;;  %s1070_s15 = smov 0  }
   0x3 LB: > { %s1085_s16 = sadd.s32 4294967295, %s1039_s15   ;;  %s646_s17 = sadd.s32 4294967294, %s1039_s15   ;;  %s1039_s15 = sphi %s1070_s15, %s1349_s15   ;;  %s1035_s14 = sphi %s1068_s14, %s1348_s14   ;;  %s1031_s13 = sphi %s1066_s13, %s1347_s13   ;;  %s1027_s12 = sphi %s1064_s12, %s1346_s12  }
   0x4   : > { %s1089_s18 = sadd.s32 1, %s1039_s15   ;;  %s91_s19 = sadd.s32 1, %s1035_s14 }
   0x5   : > { %s88_s20 = ssub.s32 %s1039_s15, %s1089_s18  ;;  %p101_p0 = scmp.ne.s32.totalorder %s1035_s14, %s1031_s13 }
   0x6   : > { %p89_p1 = scmp.eq.s32.totalorder %s88_s20, 0  ;;  %p102_p2 = scmp.eq.s32.totalorder %s1085_s16, 3 }
   0x7   : > { %p107_p3 = scmp.ne.s32.totalorder %s1031_s13, %s1027_s12  ;;  %p108_p4 = scmp.eq.s32.totalorder %s646_s17, 3 }
   0x8   : > { %s1100_s21 = scalar_select %p89_p1, %s1035_s14, %s91_s19  }
   0x9   : > { %p1102_p5 = por %p102_p2, %p101_p0  ;;  %p1106_p6 = por %p108_p4, %p107_p3 }
   0xa   : > { %p649_p7 = scmp.ge.s32.totalorder %s1039_s15, 1  ;;  %p142_p8 = scmp.lt.s32.totalorder %s1039_s15, 5 }
   0xc   : > { %p143_p9 = pnand %p649_p7, %p142_p8 }
   0xd   : > { %v654_v0 = vld [vmem:[%s1341_s1 + $0x80] sm:$0xff] (!%p143_p9)  ;;  %v655_v1 = vld [vmem:[%s1341_s1 + $0x88] sm:$0xff] (!%p143_p9)  ;;  %s651_s30 = sshll.u32 (!%p143_p9), %s1085_s16, 3  ;;  %v656_v5 = vld [vmem:[%s1341_s1 + $0x90] sm:$0xff] (!%p143_p9)  ;;  %s164_s20 = sand.u32 (!%p143_p9), 1, %s1031_s13  }
   0xe   : > { %146 = sbr.rel (%p143_p9) target bundleno = 309 (0x135), region = 32  ;;  %v207_v2 = vld [vmem:[%s1341_s1] sm:$0xff] (!%p143_p9)  ;;  %v856_v3 = vpack.c.bf16 (!%p143_p9), %v655_v1, %v654_v0  ;;  %v208_v4 = vld [vmem:[%s1341_s1 + $0x8] sm:$0xff] (!%p143_p9)  ;;  %v657_v6 = vld [vmem:[%s1341_s1 + $0x98] sm:$0xff] (!%p143_p9)  ;;  %p168_p10 = scmp.lt.s32.totalorder (!%p143_p9), %s651_s30, 31 }
   0xf   : > { %v888_v7 = vpack.c.bf16 (!%p143_p9), %v208_v4, %v207_v2  ;;  %v860_v8 = vpack.c.bf16 (!%p143_p9), %v657_v6, %v656_v5  ;;  %v209_v9 = vld [vmem:[%s1341_s1 + $0x10] sm:$0xff] (!%p143_p9)  ;;  %v210_v10 = vld [vmem:[%s1341_s1 + $0x18] sm:$0xff] (!%p143_p9)  ;;  %v658_v11 = vld [vmem:[%s1341_s1 + $0xa0] sm:$0xff] (!%p143_p9)  ;;  %s679_s27 = sshll.u32 (!%p143_p9), %s1085_s16, 11  ;;  %s1299_s16 = scalar_lea.sflag (!%p143_p9), [#allocation3], %s164_s20 }
  0x10   : > { %857 = vmatprep.subr.bf16.mxu1 (!%p143_p9), %v856_v3  ;;  %v892_v12 = vpack.c.bf16 (!%p143_p9), %v210_v10, %v209_v9  ;;  %v659_v13 = vld [vmem:[%s1341_s1 + $0xa8] sm:$0xff] (!%p143_p9)  ;;  %v211_v14 = vld [vmem:[%s1341_s1 + $0x20] sm:$0xff] (!%p143_p9)  ;;  %v660_v18 = vld [vmem:[%s1341_s1 + $0xb0] sm:$0xff] (!%p143_p9)  ;;  %s1041_s7 = smov (!%p143_p9), [#allocation2]  }
  0x11   : > { %v212_v15 = vld [vmem:[%s1341_s1 + $0x28] sm:$0xff] (!%p143_p9)  ;;  %889 = vmatprep.subr.bf16.mxu0 (!%p143_p9), %v888_v7  ;;  %859 = vmatpush3.bf16.msra.mxu1 (!%p143_p9), %v856_v3  ;;  %v864_v16 = vpack.c.bf16 (!%p143_p9), %v659_v13, %v658_v11  ;;  %v661_v19 = vld [vmem:[%s1341_s1 + $0xb8] sm:$0xff] (!%p143_p9)  ;;  %v213_v20 = vld [vmem:[%s1341_s1 + $0x30] sm:$0xff] (!%p143_p9)  ;;  %s981_s8 = sshll.u32 (!%p143_p9), %s1041_s7, 4  ;;  %s982_s8 = int_to_ptr.vmem [resolvable:$false] %s981_s8 }
  0x12   : > { %891 = vmatpush3.bf16.msra.mxu0 (!%p143_p9), %v888_v7  ;;  %861 = vmatprep.subr.bf16.mxu1 (!%p143_p9), %v860_v8  ;;  %v896_v17 = vpack.c.bf16 (!%p143_p9), %v212_v15, %v211_v14  ;;  %v214_v21 = vld [vmem:[%s1341_s1 + $0x38] sm:$0xff] (!%p143_p9)  ;;  %v868_v22 = vpack.c.bf16 (!%p143_p9), %v661_v19, %v660_v18  ;;  %v662_v24 = vld [vmem:[%s1341_s1 + $0xc0] sm:$0xff] (!%p143_p9)  ;;  %v663_v25 = vld [vmem:[%s1341_s1 + $0xc8] sm:$0xff] (!%p143_p9)  ;;  %s983_s9 = scalar_lea.vmem (!%p143_p9), %s982_s8, 4096 }
  0x13   : > { %893 = vmatprep.subr.bf16.mxu0 (!%p143_p9), %v892_v12  ;;  %v900_v23 = vpack.c.bf16 (!%p143_p9), %v214_v21, %v213_v20  ;;  %v215_v27 = vld [vmem:[%s1341_s1 + $0x40] sm:$0xff] (!%p143_p9)  ;;  %v216_v28 = vld [vmem:[%s1341_s1 + $0x48] sm:$0xff] (!%p143_p9)  ;;  %v872_v30 = vpack.c.bf16 (!%p143_p9), %v663_v25, %v662_v24  ;;  %v664_v32 = vld [vmem:[%s1341_s1 + $0xd0] sm:$0xff] (!%p143_p9) }
  0x14   : > { %v904_v31 = vpack.c.bf16 (!%p143_p9), %v216_v28, %v215_v27  ;;  %v665_v33 = vld [vmem:[%s1341_s1 + $0xd8] sm:$0xff] (!%p143_p9)  ;;  %v217_v34 = vld [vmem:[%s1341_s1 + $0x50] sm:$0xff] (!%p143_p9)  ;;  %v666_v38 = vld [vmem:[%s1341_s1 + $0xe0] sm:$0xff] (!%p143_p9) }
  0x15   : > { %s1351_s30 = smov (!%p168_p10, %s651_s30), 31  ;;  %863 = vmatpush3.bf16.msra.mxu1 %v860_v8  ;;  %v218_v35 = vld [vmem:[%s1341_s1 + $0x58] sm:$0xff]  ;;  %v876_v36 = vpack.c.bf16 %v665_v33, %v664_v32  ;;  %v667_v39 = vld [vmem:[%s1341_s1 + $0xe8] sm:$0xff]  ;;  %v219_v40 = vld [vmem:[%s1341_s1 + $0x60] sm:$0xff] }
  0x16   : > { %s677_s5 = sshll.u32 %s1351_s30, 5  ;;  %895 = vmatpush3.bf16.msra.mxu0 %v892_v12  ;;  %865 = vmatprep.subr.bf16.mxu1 %v864_v16  ;;  %v908_v37 = vpack.c.bf16 %v218_v35, %v217_v34  ;;  %v220_v41 = vld [vmem:[%s1341_s1 + $0x68] sm:$0xff]  ;;  %v880_v42 = vpack.c.bf16 %v667_v39, %v666_v38  ;;  %v668_v44 = vld [vmem:[%s1341_s1 + $0xf0] sm:$0xff]  ;;  %v669_v45 = vld [vmem:[%s1341_s1 + $0xf8] sm:$0xff]  ;;  %s650_s30 = sshll.u32 %s164_s20, 7 }
  0x17   : > { %s1164_s24 = scalar_lea.vmem %s1340_s0, %s677_s5  ;;  %897 = vmatprep.subr.bf16.mxu0 %v896_v17  ;;  %v912_v43 = vpack.c.bf16 %v220_v41, %v219_v40  ;;  %v221_v46 = vld [vmem:[%s1341_s1 + $0x70] sm:$0xff]  ;;  %v222_v47 = vld [vmem:[%s1341_s1 + $0x78] sm:$0xff]  ;;  %v884_v48 = vpack.c.bf16 %v669_v45, %v668_v44  ;;  %v1252_v18 = vld [vmem:[%s1342_s2] ss:$0 sm:$0xff]  ;;  %s1290_s5 = scalar_lea.hbm %s1343_s3, %s679_s27 }
  0x18   : > { %v177_v26 = vld [vmem:[%s1164_s24 + $0x10] sm:$0xff]  ;;  %v175_v29 = vld [vmem:[%s1164_s24] sm:$0xff]  ;;  %v916_v49 = vpack.c.bf16 %v222_v47, %v221_v46  ;;  %v178_v50 = vld [vmem:[%s1164_s24 + $0x18] sm:$0xff] }
  0x19   : > { %776 = vmatprep.mubr.f32.mxu1 %v177_v26  ;;  %867 = vmatpush3.bf16.msra.mxu1 %v864_v16  ;;  %v176_v51 = vld [vmem:[%s1164_s24 + $0x8] sm:$0xff]  ;;  %v181_v52 = vld [vmem:[%s1164_s24 + $0x30] sm:$0xff]  ;;  %v179_v53 = vld [vmem:[%s1164_s24 + $0x20] sm:$0xff] }
  0x1a   : > { %832 = vmatprep.mubr.f32.mxu0 %v175_v29  ;;  %899 = vmatpush3.bf16.msra.mxu0 %v896_v17  ;;  %v182_v54 = vld [vmem:[%s1164_s24 + $0x38] sm:$0xff]  ;;  %v180_v55 = vld [vmem:[%s1164_s24 + $0x28] sm:$0xff]  ;;  %v185_v56 = vld [vmem:[%s1164_s24 + $0x50] sm:$0xff] }
  0x1b   : > { %869 = vmatprep.subr.bf16.mxu1 %v868_v22  ;;  %901 = vmatprep.subr.bf16.mxu0 %v900_v23  ;;  %v183_v57 = vld [vmem:[%s1164_s24 + $0x40] sm:$0xff]  ;;  %v186_v58 = vld [vmem:[%s1164_s24 + $0x58] sm:$0xff]  ;;  %v184_v59 = vld [vmem:[%s1164_s24 + $0x48] sm:$0xff] }
  0x1c   : > { %v189_v60 = vld [vmem:[%s1164_s24 + $0x70] sm:$0xff]  ;;  %v187_v61 = vld [vmem:[%s1164_s24 + $0x60] sm:$0xff]  ;;  %v190_v62 = vld [vmem:[%s1164_s24 + $0x78] sm:$0xff] }
  0x1d   : > { %871 = vmatpush3.bf16.msra.mxu1 %v868_v22  ;;  %v188_v63 = vld [vmem:[%s1164_s24 + $0x68] sm:$0xff]  ;;  %v193_v0 = vld [vmem:[%s1164_s24 + $0x90] sm:$0xff]  ;;  %v191_v1 = vld [vmem:[%s1164_s24 + $0x80] sm:$0xff] }
  0x1e   : > { %903 = vmatpush3.bf16.msra.mxu0 %v900_v23  ;;  %873 = vmatprep.subr.bf16.mxu1 %v872_v30  ;;  %v194_v2 = vld [vmem:[%s1164_s24 + $0x98] sm:$0xff]  ;;  %v192_v3 = vld [vmem:[%s1164_s24 + $0x88] sm:$0xff]  ;;  %v197_v4 = vld [vmem:[%s1164_s24 + $0xb0] sm:$0xff] }
  0x1f   : > { %905 = vmatprep.subr.bf16.mxu0 %v904_v31  ;;  %v195_v5 = vld [vmem:[%s1164_s24 + $0xa0] sm:$0xff]  ;;  %v198_v6 = vld [vmem:[%s1164_s24 + $0xb8] sm:$0xff]  ;;  %v196_v7 = vld [vmem:[%s1164_s24 + $0xa8] sm:$0xff] }
  0x20   : > { %v201_v8 = vld [vmem:[%s1164_s24 + $0xd0] sm:$0xff]  ;;  %v199_v9 = vld [vmem:[%s1164_s24 + $0xc0] sm:$0xff]  ;;  %v202_v10 = vld [vmem:[%s1164_s24 + $0xd8] sm:$0xff] }
  0x21   : > { %875 = vmatpush3.bf16.msra.mxu1 %v872_v30  ;;  %v200_v11 = vld [vmem:[%s1164_s24 + $0xc8] sm:$0xff]  ;;  %v205_v12 = vld [vmem:[%s1164_s24 + $0xf0] sm:$0xff]  ;;  %v203_v13 = vld [vmem:[%s1164_s24 + $0xe0] sm:$0xff] }
  0x22   : > { %907 = vmatpush3.bf16.msra.mxu0 %v904_v31  ;;  %877 = vmatprep.subr.bf16.mxu1 %v876_v36  ;;  %v206_v14 = vld [vmem:[%s1164_s24 + $0xf8] sm:$0xff]  ;;  %v204_v15 = vld [vmem:[%s1164_s24 + $0xe8] sm:$0xff]  ;;  %s1256_s24 = scalar_lea.vmem [#allocation2], %s650_s30 }
  0x23   : > { %909 = vmatprep.subr.bf16.mxu0 %v908_v37  ;;  %s584_s28 = sshll.u32 %s1256_s24, 4  ;;  %s1292_s28 = int_to_ptr.vmem [resolvable:$true] %s584_s28 }
  0x24   : > { %s977_s6 = scalar_lea.vmem %s1292_s28, 2048  ;;  %p984_p0 = scmp.lt.s32.totalorder %s1292_s28, %s982_s8 }
  0x25   : > { %879 = vmatpush3.bf16.msra.mxu1 %v876_v36  ;;  %p978_p11 = scmp.ne.s32.totalorder %s1292_s28, %s977_s6  ;;  %p985_p1 = scmp.lt.s32.totalorder %s983_s9, %s977_s6 }
  0x26   : > { %911 = vmatpush3.bf16.msra.mxu0 %v908_v37  ;;  %881 = vmatprep.subr.bf16.mxu1 %v880_v42 }
  0x27   : > { %913 = vmatprep.subr.bf16.mxu0 %v912_v43  ;;  %p979_p12 = pnand %p978_p11, %p1102_p5  ;;  %p986_p2 = por %p985_p1, %p984_p0 }
  0x29   : > { %883 = vmatpush3.bf16.msra.mxu1 %v880_v42  ;;  %p980_p13 = pneg %p979_p12 }
  0x2a   : > { %915 = vmatpush3.bf16.msra.mxu0 %v912_v43  ;;  %885 = vmatprep.subr.bf16.mxu1 %v884_v48 }
  0x2b   : > { %917 = vmatprep.subr.bf16.mxu0 %v916_v49  ;;  %p987_p3 = pnand %p986_p2, %p980_p13 }
  0x2d   : > { %887 = vmatpush3.bf16.msra.mxu1 %v884_v48 }
  0x2e   : > { %919 = vmatpush3.bf16.msra.mxu0 %v916_v49 }
  0x30   : > { %777 = vmatmul.mubr.f32.vlgmr.msra.gmra.mrb[0].mxu1 %v178_v50 }
  0x31   : > { %833 = vmatmul.mubr.f32.vlgmr.msra.gmra.mrb[0].mxu0 %v176_v51  ;;  %779 = vmatprep.mubr.f32.mxu1 %v181_v52 }
  0x32   : > { %835 = vmatprep.mubr.f32.mxu0 %v179_v53 }
  0x34   : > { %780 = vmatmul.mubr.f32.gmra.mrb[2].mxu1 %v182_v54 }
  0x35   : > { %836 = vmatmul.mubr.f32.gmra.mrb[2].mxu0 %v180_v55  ;;  %782 = vmatprep.mubr.f32.mxu1 %v185_v56 }
  0x36   : > { %838 = vmatprep.mubr.f32.mxu0 %v183_v57 }
  0x38   : > { %783 = vmatmul.mubr.f32.gmra.mrb[4].mxu1 %v186_v58 }
  0x39   : > { %839 = vmatmul.mubr.f32.gmra.mrb[4].mxu0 %v184_v59  ;;  %785 = vmatprep.mubr.f32.mxu1 %v189_v60 }
  0x3a   : > { %841 = vmatprep.mubr.f32.mxu0 %v187_v61 }
  0x3c   : > { %786 = vmatmul.mubr.f32.gmra.mrb[6].mxu1 %v190_v62 }
  0x3d   : > { %842 = vmatmul.mubr.f32.gmra.mrb[6].mxu0 %v188_v63  ;;  %788 = vmatprep.mubr.f32.mxu1 %v193_v0 }
  0x3e   : > { %844 = vmatprep.mubr.f32.mxu0 %v191_v1 }
  0x40   : > { %789 = vmatmul.mubr.f32.gmra.mrb[8].mxu1 %v194_v2 }
  0x41   : > { %845 = vmatmul.mubr.f32.gmra.mrb[8].mxu0 %v192_v3  ;;  %791 = vmatprep.mubr.f32.mxu1 %v197_v4 }
  0x42   : > { %847 = vmatprep.mubr.f32.mxu0 %v195_v5 }
  0x44   : > { %792 = vmatmul.mubr.f32.gmra.mrb[10].mxu1 %v198_v6 }
  0x45   : > { %848 = vmatmul.mubr.f32.gmra.mrb[10].mxu0 %v196_v7  ;;  %794 = vmatprep.mubr.f32.mxu1 %v201_v8 }
  0x46   : > { %850 = vmatprep.mubr.f32.mxu0 %v199_v9 }
  0x48   : > { %795 = vmatmul.mubr.f32.gmra.mrb[12].mxu1 %v202_v10 }
  0x49   : > { %851 = vmatmul.mubr.f32.gmra.mrb[12].mxu0 %v200_v11  ;;  %797 = vmatprep.mubr.f32.mxu1 %v205_v12 }
  0x4a   : > { %853 = vmatprep.mubr.f32.mxu0 %v203_v13 }
  0x4c   : > { %798 = vmatmul.mubr.f32.gmra.mrb[14].mxu1 %v206_v14 }
  0x4d   : > { %854 = vmatmul.mubr.f32.gmra.mrb[14].mxu0 %v204_v15 }
 0x103   : > { %v778_v16 = vpop.f32.mrb[0].mxu1 }
 0x104   : > { %v834_v17 = vpop.f32.mrb[0].mxu0  ;;  %v306_v19 = vpop.f32.mrb[1].mxu1 }
 0x105   : > { %v457_v20 = vadd.f32 %v834_v17, %v778_v16  ;;  %v451_v21 = vpop.f32.mrb[1].mxu0 }
 0x106   : > { %v452_v22 = vadd.f32 %v451_v21, %v306_v19 }
 0x107   : > { %v538_v23 = vadd.f32 %v1252_v18, %v457_v20  ;;  %v781_v24 = vpop.f32.mrb[2].mxu1 }
 0x108   : > { %v537_v25 = vadd.f32 %v1252_v18, %v452_v22  ;;  %v837_v26 = vpop.f32.mrb[2].mxu0  ;;  %v316_v27 = vpop.f32.mrb[3].mxu1 }
 0x109   : > { %554 = vst [vmem:[%s1256_s24 + $0x8] sm:$0xff] %v538_v23  ;;  %v467_v28 = vadd.f32 %v837_v26, %v781_v24  ;;  %v461_v29 = vpop.f32.mrb[3].mxu0 }
 0x10a   : > { %553 = vst [vmem:[%s1256_s24] sm:$0xff] %v537_v25  ;;  %v462_v30 = vadd.f32 %v461_v29, %v316_v27 }
 0x10b   : > { %v540_v31 = vadd.f32 %v1252_v18, %v467_v28  ;;  %v784_v32 = vpop.f32.mrb[4].mxu1 }
 0x10c   : > { %v539_v33 = vadd.f32 %v1252_v18, %v462_v30  ;;  %v840_v34 = vpop.f32.mrb[4].mxu0  ;;  %v326_v35 = vpop.f32.mrb[5].mxu1 }
 0x10d   : > { %556 = vst [vmem:[%s1256_s24 + $0x18] sm:$0xff] %v540_v31  ;;  %v477_v36 = vadd.f32 %v840_v34, %v784_v32  ;;  %v471_v37 = vpop.f32.mrb[5].mxu0 }
 0x10e   : > { %555 = vst [vmem:[%s1256_s24 + $0x10] sm:$0xff] %v539_v33  ;;  %v472_v38 = vadd.f32 %v471_v37, %v326_v35 }
 0x10f   : > { %v542_v39 = vadd.f32 %v1252_v18, %v477_v36  ;;  %v787_v40 = vpop.f32.mrb[6].mxu1 }
 0x110   : > { %v541_v41 = vadd.f32 %v1252_v18, %v472_v38  ;;  %v843_v42 = vpop.f32.mrb[6].mxu0  ;;  %v336_v43 = vpop.f32.mrb[7].mxu1 }
 0x111   : > { %558 = vst [vmem:[%s1256_s24 + $0x28] sm:$0xff] %v542_v39  ;;  %v487_v44 = vadd.f32 %v843_v42, %v787_v40  ;;  %v481_v45 = vpop.f32.mrb[7].mxu0 }
 0x112   : > { %557 = vst [vmem:[%s1256_s24 + $0x20] sm:$0xff] %v541_v41  ;;  %v482_v46 = vadd.f32 %v481_v45, %v336_v43 }
 0x113   : > { %v544_v47 = vadd.f32 %v1252_v18, %v487_v44  ;;  %v790_v48 = vpop.f32.mrb[8].mxu1 }
 0x114   : > { %v543_v49 = vadd.f32 %v1252_v18, %v482_v46  ;;  %v846_v50 = vpop.f32.mrb[8].mxu0  ;;  %v346_v51 = vpop.f32.mrb[9].mxu1 }
 0x115   : > { %560 = vst [vmem:[%s1256_s24 + $0x38] sm:$0xff] %v544_v47  ;;  %v497_v52 = vadd.f32 %v846_v50, %v790_v48  ;;  %v491_v53 = vpop.f32.mrb[9].mxu0 }
 0x116   : > { %559 = vst [vmem:[%s1256_s24 + $0x30] sm:$0xff] %v543_v49  ;;  %v492_v54 = vadd.f32 %v491_v53, %v346_v51 }
 0x117   : > { %v546_v55 = vadd.f32 %v1252_v18, %v497_v52  ;;  %v793_v56 = vpop.f32.mrb[10].mxu1 }
 0x118   : > { %v545_v57 = vadd.f32 %v1252_v18, %v492_v54  ;;  %v849_v58 = vpop.f32.mrb[10].mxu0  ;;  %v356_v59 = vpop.f32.mrb[11].mxu1 }
 0x119   : > { %562 = vst [vmem:[%s1256_s24 + $0x48] sm:$0xff] %v546_v55  ;;  %v507_v60 = vadd.f32 %v849_v58, %v793_v56  ;;  %v501_v61 = vpop.f32.mrb[11].mxu0 }
 0x11a   : > { %561 = vst [vmem:[%s1256_s24 + $0x40] sm:$0xff] %v545_v57  ;;  %v502_v62 = vadd.f32 %v501_v61, %v356_v59 }
 0x11b   : > { %v548_v63 = vadd.f32 %v1252_v18, %v507_v60  ;;  %v796_v0 = vpop.f32.mrb[12].mxu1 }
 0x11c   : > { %v547_v1 = vadd.f32 %v1252_v18, %v502_v62  ;;  %v852_v2 = vpop.f32.mrb[12].mxu0  ;;  %v366_v3 = vpop.f32.mrb[13].mxu1 }
 0x11d   : > { %564 = vst [vmem:[%s1256_s24 + $0x58] sm:$0xff] %v548_v63  ;;  %v517_v4 = vadd.f32 %v852_v2, %v796_v0  ;;  %v511_v5 = vpop.f32.mrb[13].mxu0 }
 0x11e   : > { %563 = vst [vmem:[%s1256_s24 + $0x50] sm:$0xff] %v547_v1  ;;  %v512_v6 = vadd.f32 %v511_v5, %v366_v3 }
 0x11f   : > { %v550_v7 = vadd.f32 %v1252_v18, %v517_v4  ;;  %v799_v8 = vpop.f32.mrb[14].mxu1 }
 0x120   : > { %v549_v9 = vadd.f32 %v1252_v18, %v512_v6  ;;  %v855_v10 = vpop.f32.mrb[14].mxu0  ;;  %v376_v11 = vpop.f32.mrb[15].mxu1 }
 0x121   : > { %566 = vst [vmem:[%s1256_s24 + $0x68] sm:$0xff] %v550_v7  ;;  %v527_v12 = vadd.f32 %v855_v10, %v799_v8  ;;  %v521_v13 = vpop.f32.mrb[15].mxu0 }
 0x122   : > { %565 = vst [vmem:[%s1256_s24 + $0x60] sm:$0xff] %v549_v9  ;;  %v522_v14 = vadd.f32 %v521_v13, %v376_v11 }
 0x123   : > { %v552_v15 = vadd.f32 %v1252_v18, %v527_v12 }
 0x124   : > { %v551_v16 = vadd.f32 %v1252_v18, %v522_v14 }
 0x125   : > { %568 = vst [vmem:[%s1256_s24 + $0x78] sm:$0xff] %v552_v15 }
 0x126   : > { %567 = vst [vmem:[%s1256_s24 + $0x70] sm:$0xff] %v551_v16 }
 0x127   : > { %990 = shalt.err (!%p987_p3)
}
 0x128   : > { %s991_s10 = scalar_lea.hbm %s1290_s5, 2048  ;;  %s995_s19 = scalar_lea.hbm %s1343_s3, 8192 }
 0x129   : > { %p992_p4 = scmp.ne.s32.totalorder %s1290_s5, %s991_s10  ;;  %p996_p9 = scmp.lt.u32.totalorder %s1290_s5, %s1343_s3 }
 0x12a   : > { %p997_p10 = scmp.lt.u32.totalorder %s995_s19, %s991_s10  ;;  %p999_p12 = scmp.lt.u32.totalorder %s991_s10, %s1290_s5 }
 0x12b   : > { %p993_p7 = pnand %p992_p4, %p1102_p5 }
 0x12c   : > { %p998_p11 = por %p997_p10, %p996_p9 }
 0x12d   : > { %p994_p8 = pneg %p993_p7 }
 0x12e   : > { %p1000_p13 = por %p999_p12, %p998_p11 }
 0x130   : > { %p1001_p0 = pnand %p1000_p13, %p994_p8 }
 0x132   : > { %1004 = shalt.err (!%p1001_p0)
}
 0x133   : > { %s1042_s25 = smov 128   ;;  %s1043_s26 = smov 8  }
 0x134   : > { %936 = dma.vmem_to_hbm [thread:$0]  (%p1102_p5), %s1292_s28, 2048, %s1290_s5, %s1299_s16, %s1042_s25, %s1042_s25, %s1043_s26  }
 0x135 PF: > { %p942_p1 = scmp.ge.s32.totalorder %s1039_s15, 2  ;;  %s599_s24 = sand.u32 1, %s1027_s12  }
 0x136   : > { %s600_s27 = scalar_lea.sflag [#allocation3], %s599_s24 }
 0x137   : > { %p939_p2 = pnand %p942_p1, %p1106_p6 }
 0x139   : > { %1022 = dma.done.wait (!%p939_p2), %s600_s27, 2048  }
 0x13a   : > { %1024 = vsyncadd (!%p939_p2), %s600_s27, 4294965248  ;;  %p13_p3 = scmp.ge.s32.totalorder %s1089_s18, 6   ;;  %s1346_s12 = smov %s1031_s13 }
 0x13b   : > { %s1347_s13 = smov %s1035_s14  ;;  %s1348_s14 = smov %s1100_s21 }
 0x13c   : > { %s1349_s15 = smov %s1089_s18  ;;  %15 = sbr.rel (!%p13_p3) target bundleno = 3 (0x3), region = 68 }
 0x143   :  { %605 = vsyncpa [#allocation3], 1 }
 0x144   :  { %607 = vsyncpa [#allocation3 + $0x1], 1 }

</bundles_post_ra>
